<compile_context>
chip_gen: v5e
topology: v5e:2x2
jax: 0.10.0
libtpu: 0.0.40
codegen_flags: <defaults>
</compile_context>

<pallas_src>
import functools
import math

import jax
import jax.numpy as jnp
from jax import lax
from jax.experimental import pallas as pl
from jax.experimental.pallas import tpu as pltpu


def _conv_stats_kernel(w_ref, x_ref, y_ref, s_ref, ss_ref):
    # w_ref : (Cout, K)    bf16   tap-major weights, K = 16*Cin
    # x_ref : (K, TM)      bf16   im2col tile (TM output pixels on the lane axis)
    # y_ref : (Cout, TM)   f32    pre-norm conv output tile
    # s_ref : (1, Cout, 1) f32    per-tile per-channel sum          (BN partial stats)
    # ss_ref: (1, Cout, 1) f32    per-tile per-channel sum of squares
    y = jnp.dot(w_ref[...], x_ref[...], preferred_element_type=jnp.float32)
    y_ref[...] = y
    s_ref[0] = jnp.sum(y, axis=1, keepdims=True)
    ss_ref[0] = jnp.sum(y * y, axis=1, keepdims=True)


def _norm_lrelu_kernel(scale_ref, shift_ref, y_ref, o_ref, *, slope):
    # (y - mean) * inv  ==  y * scale + shift   with scale = inv, shift = -mean*inv
    y = y_ref[...] * scale_ref[...] + shift_ref[...]
    o_ref[...] = jnp.where(y >= 0, y, slope * y)


@functools.partial(jax.jit,
                   static_argnames=("stride", "dilation", "tile_m", "eps", "slope"))
def conv_bn_lrelu_block(x_cnhw, w_oihw, *, stride, dilation,
                        tile_m=512, eps=1e-5, slope=0.2):
    """Conv2d(4x4, pad=1) + BatchNorm2d(affine=False, batch stats) + LeakyReLU(0.2).

    x_cnhw : (Cin, N, H, W) float32 activation (channel-major between blocks)
    w_oihw : (Cout, Cin, 4, 4) float32 PyTorch-layout weights
    returns: (Cout, N, Ho, Wo) float32
    """
    Cin, N, H, W = x_cnhw.shape
    Cout = w_oihw.shape[0]
    assert w_oihw.shape == (Cout, Cin, 4, 4)
    d = dilation
    if stride == 1:
        Ho, Wo = H + 2 - 3 * d, W + 2 - 3 * d
    else:
        assert stride == 2 and dilation == 1
        Ho = (H + 2 - 4) // 2 + 1
        Wo = (W + 2 - 4) // 2 + 1
    assert Ho > 0 and Wo > 0, "spatial size too small for this dilation"

    K = 16 * Cin
    M = N * Ho * Wo

    # ---- wrapper-side im2col (pure data movement done by XLA) --------------------------
    xp = jnp.pad(x_cnhw, ((0, 0), (0, 0), (1, 1), (1, 1)))            # zero padding = 1
    taps = []
    for kh in range(4):
        for kw in range(4):
            sl = xp[:, :, kh * d::stride, kw * d::stride][:, :, :Ho, :Wo]  # (Cin,N,Ho,Wo)
            taps.append(sl)
    # row = (kh*4 + kw)*Cin + c ; col = n*Ho*Wo + i*Wo + j
    xc = jnp.stack(taps, axis=0).reshape(K, M).astype(jnp.bfloat16)

    # tap-major weights matching xc rows: (Cout, 16*Cin)
    wt = jnp.transpose(w_oihw, (0, 2, 3, 1)).reshape(Cout, K).astype(jnp.bfloat16)

    # ---- lane-axis (M) tiling ------------------------------------------------------------
    tm = min(tile_m, ((M + 127) // 128) * 128)
    m_pad = ((M + tm - 1) // tm) * tm
    n_tiles = m_pad // tm
    if m_pad != M:
        # zero columns -> zero conv output -> contribute nothing to the BN partial stats
        xc = jnp.pad(xc, ((0, 0), (0, m_pad - M)))

    # ---- kernel A: conv matmul + BatchNorm partial statistics ----------------------------
    y_t, s_part, ss_part = pl.pallas_call(
        _conv_stats_kernel,
        grid=(n_tiles,),
        in_specs=[
            pl.BlockSpec((Cout, K), lambda m: (0, 0)),
            pl.BlockSpec((K, tm), lambda m: (0, m)),
        ],
        out_specs=[
            pl.BlockSpec((Cout, tm), lambda m: (0, m)),
            pl.BlockSpec((1, Cout, 1), lambda m: (m, 0, 0)),
            pl.BlockSpec((1, Cout, 1), lambda m: (m, 0, 0)),
        ],
        out_shape=[
            jax.ShapeDtypeStruct((Cout, m_pad), jnp.float32),
            jax.ShapeDtypeStruct((n_tiles, Cout, 1), jnp.float32),
            jax.ShapeDtypeStruct((n_tiles, Cout, 1), jnp.float32),
        ],
        compiler_params=pltpu.CompilerParams(dimension_semantics=("parallel",)),
    )(wt, xc)

    # ---- BatchNorm finalize: (Cout,)-sized glue, training-mode batch statistics ----------
    nel = float(M)
    s_tot = jnp.sum(s_part, axis=0)[:, 0]                 # (Cout,)
    ss_tot = jnp.sum(ss_part, axis=0)[:, 0]
    mean = s_tot / nel
    var = ss_tot / nel - mean * mean                      # biased variance (BN training mode)
    # NOTE: E[x^2]-E[x]^2 in f32 is adequate here (bias-free conv output is ~zero-centred).
    # TODO(synk): use a two-pass / Welford reduction if a tighter match to PyTorch is needed.
    inv = lax.rsqrt(var + eps)
    scale = inv.reshape(Cout, 1).astype(jnp.float32)
    shift = (-mean * inv).reshape(Cout, 1).astype(jnp.float32)

    # ---- kernel B: fused normalize + LeakyReLU --------------------------------------------
    out = pl.pallas_call(
        functools.partial(_norm_lrelu_kernel, slope=slope),
        grid=(n_tiles,),
        in_specs=[
            pl.BlockSpec((Cout, 1), lambda m: (0, 0)),
            pl.BlockSpec((Cout, 1), lambda m: (0, 0)),
            pl.BlockSpec((Cout, tm), lambda m: (0, m)),
        ],
        out_specs=pl.BlockSpec((Cout, tm), lambda m: (0, m)),
        out_shape=jax.ShapeDtypeStruct((Cout, m_pad), jnp.float32),
        compiler_params=pltpu.CompilerParams(dimension_semantics=("parallel",)),
    )(scale, shift, y_t)

    return out[:, :M].reshape(Cout, N, Ho, Wo)


def init_generator_params(key, in_channels, initial_channels_out):
    c0 = initial_channels_out
    # (in_ch, out_ch, stride, dilation) exactly as in Generator_unfinished.__init__
    defs = [
        (in_channels, c0 * 1, 2, 1),    # conv1  (StandardConvBlock)
        (c0 * 1,      c0 * 2, 1, 2),    # dconv2
        (c0 * 2,      c0 * 4, 1, 4),    # dconv3
        (c0 * 4,      c0 * 8, 1, 8),    # dconv4
        (c0 * 8,      c0 * 8, 1, 16),   # dconv5
        (c0 * 8,      c0 * 8, 1, 32),   # dconv6
    ]
    params = []
    for idx, (ci, co, s, d) in enumerate(defs):
        kw_, kb_ = jax.random.split(jax.random.fold_in(key, idx))
        fan_in = ci * 16
        w = jax.random.normal(kw_, (co, ci, 4, 4), jnp.float32) / math.sqrt(fan_in)
        # Bias kept for interface parity with the PyTorch module but intentionally unused:
        # with BatchNorm2d(affine=False) in training mode a per-channel constant bias
        # cancels exactly (batch mean / variance are shift-invariant).
        b = 0.01 * jax.random.normal(kb_, (co,), jnp.float32)
        params.append(dict(w=w, b=b, stride=s, dilation=d))
    return params


def generator_forward(params, x_nchw):
    # NCHW in (PyTorch convention) -> channel-major (C, N, H, W) internally -> NCHW out
    x = jnp.transpose(x_nchw, (1, 0, 2, 3)).astype(jnp.float32)
    for p in params:
        x = conv_bn_lrelu_block(x, p["w"], stride=p["stride"], dilation=p["dilation"])
    return jnp.transpose(x, (1, 0, 2, 3))


if __name__ == "__main__":
    # The dilation stack (2,4,8,16,32 with 4x4 kernels, pad=1, stride-2 first block) needs
    # spatial >= 358 to keep every intermediate positive, so 360x360 is the smallest "small"
    # shape consistent with the module.  Channels stay small (initial_channels_out=4).
    key = jax.random.PRNGKey(0)
    N, Cin, H, W = 1, 3, 360, 360
    C0 = 4

    x = jax.random.normal(key, (N, Cin, H, W), jnp.float32)       # NCHW, like PyTorch
    params = init_generator_params(jax.random.PRNGKey(0), Cin, C0)

    out = generator_forward(params, x)
    out = jax.block_until_ready(out)

    # expected chain: 360 -> 180 -> 176 -> 166 -> 144 -> 98 -> 4 ; channels end at 8*C0
    assert out.shape == (N, C0 * 8, 4, 4), out.shape
    assert bool(jnp.all(jnp.isfinite(out)))
    print("KERNEL_OK")
</pallas_src>

<mosaic_0001>
module attributes {stable_mosaic.version = 11 : i64} {
  func.func @_conv_stats_kernel(%arg0: i32, %arg1: memref<4x48xbf16, #tpu.memory_space<vmem>>, %arg2: memref<48x512xbf16, #tpu.memory_space<vmem>>, %arg3: memref<4x512xf32, #tpu.memory_space<vmem>>, %arg4: memref<1x4x1xf32, #tpu.memory_space<vmem>>, %arg5: memref<1x4x1xf32, #tpu.memory_space<vmem>>) attributes {dimension_semantics = [#tpu.dimension_semantics<parallel>], iteration_bounds = array<i64: 64>, scalar_prefetch = 0 : i64, scratch_operands = 0 : i64, tpu.core_type = #tpu.core_type<tc>, window_params = [{pipeline_mode = #tpu.pipeline_mode<synchronous>, transform_indices = @transform_0, window_bounds = array<i64: 4, 48>}, {transform_indices = @transform_1, window_bounds = array<i64: 48, 512>}, {transform_indices = @transform_2, window_bounds = array<i64: 4, 512>}, {transform_indices = @transform_3, window_bounds = array<i64: 1, 4, 1>}, {transform_indices = @transform_4, window_bounds = array<i64: 1, 4, 1>}]} {
    %c0 = arith.constant 0 : index
    %c0_0 = arith.constant 0 : index
    %0 = vector.load %arg1[%c0, %c0_0] : memref<4x48xbf16, #tpu.memory_space<vmem>>, vector<4x48xbf16>
    %c0_1 = arith.constant 0 : index
    %c0_2 = arith.constant 0 : index
    %1 = vector.load %arg2[%c0_1, %c0_2] : memref<48x512xbf16, #tpu.memory_space<vmem>>, vector<48x512xbf16>
    %cst = arith.constant dense<0.000000e+00> : vector<4x512xf32>
    %2 = tpu.matmul %0, %1, %cst {dimension_numbers = #tpu.dot_dimension_numbers<[1], [0], [0], [1], [0, 0, 1, 1], [], []>} : vector<4x48xbf16>, vector<48x512xbf16>, vector<4x512xf32> -> vector<4x512xf32>
    %c0_3 = arith.constant 0 : index
    %c0_4 = arith.constant 0 : index
    %3 = vector.load %arg3[%c0_3, %c0_4] : memref<4x512xf32, #tpu.memory_space<vmem>>, vector<4x512xf32>
    tpu.vector_store %arg3[%c0_3, %c0_4], %2 {strides = array<i32>} : memref<4x512xf32, #tpu.memory_space<vmem>>, vector<4x512xf32>,
    %cst_5 = arith.constant dense<0.000000e+00> : vector<4xf32>
    %4 = vector.multi_reduction <add>, %2, %cst_5 [1] : vector<4x512xf32> to vector<4xf32>
    %5 = vector.shape_cast %4 : vector<4xf32> to vector<4x1xf32>
    %c0_6 = arith.constant 0 : index
    %c0_7 = arith.constant 0 : index
    %c0_8 = arith.constant 0 : index
    %6 = vector.load %arg4[%c0_6, %c0_7, %c0_8] : memref<1x4x1xf32, #tpu.memory_space<vmem>>, vector<1x4x1xf32>
    %7 = vector.shape_cast %6 : vector<1x4x1xf32> to vector<4x1xf32>
    %8 = vector.shape_cast %5 : vector<4x1xf32> to vector<1x4x1xf32>
    tpu.vector_store %arg4[%c0_6, %c0_7, %c0_8], %8 {strides = array<i32>} : memref<1x4x1xf32, #tpu.memory_space<vmem>>, vector<1x4x1xf32>,
    %9 = arith.mulf %2, %2 : vector<4x512xf32>
    %cst_9 = arith.constant dense<0.000000e+00> : vector<4xf32>
    %10 = vector.multi_reduction <add>, %9, %cst_9 [1] : vector<4x512xf32> to vector<4xf32>
    %11 = vector.shape_cast %10 : vector<4xf32> to vector<4x1xf32>
    %c0_10 = arith.constant 0 : index
    %c0_11 = arith.constant 0 : index
    %c0_12 = arith.constant 0 : index
    %12 = vector.load %arg5[%c0_10, %c0_11, %c0_12] : memref<1x4x1xf32, #tpu.memory_space<vmem>>, vector<1x4x1xf32>
    %13 = vector.shape_cast %12 : vector<1x4x1xf32> to vector<4x1xf32>
    %14 = vector.shape_cast %11 : vector<4x1xf32> to vector<1x4x1xf32>
    tpu.vector_store %arg5[%c0_10, %c0_11, %c0_12], %14 {strides = array<i32>} : memref<1x4x1xf32, #tpu.memory_space<vmem>>, vector<1x4x1xf32>,
    return
  }
  func.func @transform_0(%arg0: i32) -> (i32, i32) {
    %c0_i32 = arith.constant 0 : i32
    %c0_i32_0 = arith.constant 0 : i32
    %c0_i32_1 = arith.constant 0 : i32
    return %c0_i32, %c0_i32_0 : i32, i32
  }
  func.func @transform_1(%arg0: i32) -> (i32, i32) {
    %c0_i32 = arith.constant 0 : i32
    %c0_i32_0 = arith.constant 0 : i32
    return %c0_i32, %arg0 : i32, i32
  }
  func.func @transform_2(%arg0: i32) -> (i32, i32) {
    %c0_i32 = arith.constant 0 : i32
    %c0_i32_0 = arith.constant 0 : i32
    return %c0_i32, %arg0 : i32, i32
  }
  func.func @transform_3(%arg0: i32) -> (i32, i32, i32) {
    %c0_i32 = arith.constant 0 : i32
    %c0_i32_0 = arith.constant 0 : i32
    %c0_i32_1 = arith.constant 0 : i32
    return %arg0, %c0_i32, %c0_i32_0 : i32, i32, i32
  }
  func.func @transform_4(%arg0: i32) -> (i32, i32, i32) {
    %c0_i32 = arith.constant 0 : i32
    %c0_i32_0 = arith.constant 0 : i32
    %c0_i32_1 = arith.constant 0 : i32
    return %arg0, %c0_i32, %c0_i32_0 : i32, i32, i32
  }
}

module attributes {stable_mosaic.version = 11 : i64} {
  func.func @_norm_lrelu_kernel(%arg0: i32, %arg1: memref<4x1xf32, #tpu.memory_space<vmem>>, %arg2: memref<4x1xf32, #tpu.memory_space<vmem>>, %arg3: memref<4x512xf32, #tpu.memory_space<vmem>>, %arg4: memref<4x512xf32, #tpu.memory_space<vmem>>) attributes {dimension_semantics = [#tpu.dimension_semantics<parallel>], iteration_bounds = array<i64: 64>, scalar_prefetch = 0 : i64, scratch_operands = 0 : i64, tpu.core_type = #tpu.core_type<tc>, window_params = [{pipeline_mode = #tpu.pipeline_mode<synchronous>, transform_indices = @transform_0, window_bounds = array<i64: 4, 1>}, {pipeline_mode = #tpu.pipeline_mode<synchronous>, transform_indices = @transform_1, window_bounds = array<i64: 4, 1>}, {transform_indices = @transform_2, window_bounds = array<i64: 4, 512>}, {transform_indices = @transform_3, window_bounds = array<i64: 4, 512>}]} {
    %c0 = arith.constant 0 : index
    %c0_0 = arith.constant 0 : index
    %0 = vector.load %arg3[%c0, %c0_0] : memref<4x512xf32, #tpu.memory_space<vmem>>, vector<4x512xf32>
    %c0_1 = arith.constant 0 : index
    %c0_2 = arith.constant 0 : index
    %1 = vector.load %arg1[%c0_1, %c0_2] : memref<4x1xf32, #tpu.memory_space<vmem>>, vector<4x1xf32>
    %2 = vector.broadcast %1 : vector<4x1xf32> to vector<4x512xf32>
    %3 = arith.mulf %0, %2 : vector<4x512xf32>
    %c0_3 = arith.constant 0 : index
    %c0_4 = arith.constant 0 : index
    %4 = vector.load %arg2[%c0_3, %c0_4] : memref<4x1xf32, #tpu.memory_space<vmem>>, vector<4x1xf32>
    %5 = vector.broadcast %4 : vector<4x1xf32> to vector<4x512xf32>
    %6 = arith.addf %3, %5 : vector<4x512xf32>
    %cst = arith.constant 0.000000e+00 : f32
    %7 = vector.broadcast %cst : f32 to vector<4x512xf32>
    %8 = arith.cmpf oge, %6, %7 : vector<4x512xf32>
    %cst_5 = arith.constant 2.000000e-01 : f32
    %9 = vector.broadcast %cst_5 : f32 to vector<4x512xf32>
    %10 = arith.mulf %9, %6 : vector<4x512xf32>
    %11 = arith.select %8, %6, %10 : vector<4x512xi1>, vector<4x512xf32>
    %c0_6 = arith.constant 0 : index
    %c0_7 = arith.constant 0 : index
    %12 = vector.load %arg4[%c0_6, %c0_7] : memref<4x512xf32, #tpu.memory_space<vmem>>, vector<4x512xf32>
    tpu.vector_store %arg4[%c0_6, %c0_7], %11 {strides = array<i32>} : memref<4x512xf32, #tpu.memory_space<vmem>>, vector<4x512xf32>,
    return
  }
  func.func @transform_0(%arg0: i32) -> (i32, i32) {
    %c0_i32 = arith.constant 0 : i32
    %c0_i32_0 = arith.constant 0 : i32
    %c0_i32_1 = arith.constant 0 : i32
    return %c0_i32, %c0_i32_0 : i32, i32
  }
  func.func @transform_1(%arg0: i32) -> (i32, i32) {
    %c0_i32 = arith.constant 0 : i32
    %c0_i32_0 = arith.constant 0 : i32
    %c0_i32_1 = arith.constant 0 : i32
    return %c0_i32, %c0_i32_0 : i32, i32
  }
  func.func @transform_2(%arg0: i32) -> (i32, i32) {
    %c0_i32 = arith.constant 0 : i32
    %c0_i32_0 = arith.constant 0 : i32
    return %c0_i32, %arg0 : i32, i32
  }
  func.func @transform_3(%arg0: i32) -> (i32, i32) {
    %c0_i32 = arith.constant 0 : i32
    %c0_i32_0 = arith.constant 0 : i32
    return %c0_i32, %arg0 : i32, i32
  }
}

</mosaic_0001>

<bundles_post_ra>
// kernel: conv_bn_lrelu_block.2
= control target key start
LH: loop header
LB: loop body
LE: loop exit
PB: predicated region body
PF: predicated region fallthrough
CT: control target
= control target key end

     0   :  { %s708_s15 = smov 0   ;;  %s710_s16 = smov 0   ;;  %s808_s0 = inlined_call_operand.vmem [shape: bf16[4,48], index: 0, kind: input, shape index: {}]   ;;  %s809_s1 = inlined_call_operand.vmem [shape: bf16[48,32768], index: 1, kind: input, shape index: {}]   ;;  %s810_s2 = inlined_call_operand.vmem [shape: f32[4,32768], index: 2, kind: output, shape index: {0}]   ;;  %s811_s3 = inlined_call_operand.vmem [shape: f32[64,4,1], index: 3, kind: output, shape index: {1}]   ;;  %s812_s4 = inlined_call_operand.vmem [shape: f32[64,4,1], index: 4, kind: output, shape index: {2}]  }
   0x1   :  { %s712_s17 = smov 0  }
   0x2 LB: > { %s724_s18 = sadd.s32 4294967295, %s681_s17   ;;  %s727_s19 = sadd.s32 1, %s681_s17   ;;  %s681_s17 = sphi %s712_s17, %s815_s17   ;;  %s677_s16 = sphi %s710_s16, %s814_s16   ;;  %s673_s15 = sphi %s708_s15, %s813_s15  }
   0x3   : > { %s40_s20 = ssub.s32 %s681_s17, %s727_s19  ;;  %s43_s21 = sadd.s32 1, %s677_s16 }
   0x4   : > { %p41_p0 = scmp.eq.s32.totalorder %s40_s20, 0  ;;  %p50_p1 = scmp.ne.s32.totalorder %s677_s16, %s673_s15 }
   0x5   : > { %p51_p2 = scmp.eq.s32.totalorder %s681_s17, 0  ;;  %p558_p4 = scmp.ge.s32.totalorder %s681_s17, 64 }
   0x6   : > { %s736_s22 = scalar_select %p41_p0, %s677_s16, %s43_s21  }
   0x7   : > { %p52_p3 = por %p51_p2, %p50_p1  ;;  %157 = sbr.rel (%p558_p4) target bundleno = 28 (0x1c), region = 20 }
   0xc   : > { %160 = sbr.rel (!%p52_p3) target bundleno = 28 (0x1c), region = 24  ;;  %s162_s23 = sand.u32 (%p52_p3), 1, %s677_s16  }
   0xd   : > { %s620_s24 = sshll.u32 (%p52_p3), %s681_s17, 4  ;;  %s633_s25 = smul.u32 (%p52_p3), 96, %s162_s23 }
   0xe   : > { %s167_s28 = scalar_lea.vmem (%p52_p3), %s809_s1, %s620_s24 }
   0xf   : > { %v180_v0 = vld [vmem:[%s167_s28] sm:$0xff] (%p52_p3)  ;;  %v182_v1 = vld [vmem:[%s167_s28 + $0x8] sm:$0xff] (%p52_p3)  ;;  %s164_s29 = scalar_lea.vmem (%p52_p3), [#allocation2], %s633_s25 }
  0x10   : > { %v184_v2 = vld [vmem:[%s167_s28 + $0x400] sm:$0xff] (%p52_p3)  ;;  %181 = vst [vmem:[%s164_s29] sm:$0xff] (%p52_p3), %v180_v0  ;;  %v186_v3 = vld [vmem:[%s167_s28 + $0x408] sm:$0xff] (%p52_p3) }
  0x11   : > { %183 = vst [vmem:[%s164_s29 + $0x8] sm:$0xff] %v182_v1  ;;  %v188_v4 = vld [vmem:[%s167_s28 + $0x800] sm:$0xff]  ;;  %v190_v5 = vld [vmem:[%s167_s28 + $0x808] sm:$0xff] }
  0x12   : > { %185 = vst [vmem:[%s164_s29 + $0x10] sm:$0xff] %v184_v2  ;;  %v192_v6 = vld [vmem:[%s167_s28 + $0xc00] sm:$0xff]  ;;  %v194_v7 = vld [vmem:[%s167_s28 + $0xc08] sm:$0xff] }
  0x13   : > { %187 = vst [vmem:[%s164_s29 + $0x18] sm:$0xff] %v186_v3  ;;  %v196_v8 = vld [vmem:[%s167_s28 + $0x1000] sm:$0xff]  ;;  %v198_v9 = vld [vmem:[%s167_s28 + $0x1008] sm:$0xff] }
  0x14   : > { %189 = vst [vmem:[%s164_s29 + $0x20] sm:$0xff] %v188_v4  ;;  %v200_v10 = vld [vmem:[%s167_s28 + $0x1400] sm:$0xff]  ;;  %v202_v11 = vld [vmem:[%s167_s28 + $0x1408] sm:$0xff] }
  0x15   : > { %191 = vst [vmem:[%s164_s29 + $0x28] sm:$0xff] %v190_v5 }
  0x16   : > { %193 = vst [vmem:[%s164_s29 + $0x30] sm:$0xff] %v192_v6 }
  0x17   : > { %195 = vst [vmem:[%s164_s29 + $0x38] sm:$0xff] %v194_v7 }
  0x18   : > { %197 = vst [vmem:[%s164_s29 + $0x40] sm:$0xff] %v196_v8 }
  0x19   : > { %199 = vst [vmem:[%s164_s29 + $0x48] sm:$0xff] %v198_v9 }
  0x1a   : > { %201 = vst [vmem:[%s164_s29 + $0x50] sm:$0xff] %v200_v10 }
  0x1b   : > { %203 = vst [vmem:[%s164_s29 + $0x58] sm:$0xff] %v202_v11 }
  0x1c PF: > { %p561_p5 = scmp.ge.s32.totalorder %s681_s17, 1  ;;  %p208_p6 = scmp.lt.s32.totalorder %s681_s17, 65 }
  0x1e   : > { %p209_p7 = pnand %p561_p5, %p208_p6 }
  0x1f   : > { %s215_s30 = sand.u32 (!%p209_p7), 1, %s673_s15   ;;  %s562_s9 = sshll.u32 (!%p209_p7), %s724_s18, 2 }
  0x20   : > { %212 = sbr.rel (%p209_p7) target bundleno = 314 (0x13a), region = 47  ;;  %p250_p8 = scmp.lt.s32.totalorder (!%p209_p7), %s562_s9, 255 }
  0x21   : > { %s634_s5 = smul.u32 (!%p209_p7), 96, %s215_s30  ;;  %p255_p9 = scmp.lt.s32.totalorder (!%p209_p7), %s724_s18, 63 }
  0x23   : > { %s747_s6 = scalar_lea.vmem (!%p209_p7), [#allocation2], %s634_s5 }
  0x25   : > { %v600_v12 = vld [vmem:[%s747_s6 + $0x40] sm:$0xf]  ;;  %v631_v13 = vld [vmem:[%s747_s6 + $0x4c] sm:$0xf0]  ;;  %v629_v14 = vld [vmem:[%s747_s6 + $0x44] sm:$0xf] }
  0x26   : > { %v601_v15 = vor.u32 %v631_v13, %v600_v12  ;;  %v602_v16 = vld [vmem:[%s747_s6 + $0x50] sm:$0xf0]  ;;  %v608_v17 = vld [vmem:[%s747_s6 + $0x48] sm:$0xf]  ;;  %v632_v18 = vld [vmem:[%s747_s6 + $0x54] sm:$0xf0] }
  0x27   : > { %v605_v19 = vor.u32 %v629_v14, %v602_v16  ;;  %v609_v20 = vor.u32 %v632_v18, %v608_v17  ;;  %v630_v21 = vld [vmem:[%s747_s6 + $0x4c] sm:$0xf]  ;;  %v610_v22 = vld [vmem:[%s747_s6 + $0x58] sm:$0xf0]  ;;  %v584_v23 = vld [vmem:[%s747_s6 + $0x20] sm:$0xf] }
  0x28   : > { %346 = vmatpush.bf16.msra.mxu0 %v601_v15  ;;  %v613_v24 = vor.u32 %v630_v21, %v610_v22  ;;  %v627_v25 = vld [vmem:[%s747_s6 + $0x2c] sm:$0xf0]  ;;  %v625_v26 = vld [vmem:[%s747_s6 + $0x24] sm:$0xf]  ;;  %v586_v27 = vld [vmem:[%s747_s6 + $0x30] sm:$0xf0] }
  0x29   : > { %359 = vmatpush.bf16.msra.mxu1 %v605_v19  ;;  %372 = vmatpush.bf16.msra.mxu2 %v609_v20  ;;  %v585_v28 = vor.u32 %v627_v25, %v584_v23  ;;  %v589_v29 = vor.u32 %v625_v26, %v586_v27  ;;  %v592_v30 = vld [vmem:[%s747_s6 + $0x28] sm:$0xf]  ;;  %v628_v31 = vld [vmem:[%s747_s6 + $0x34] sm:$0xf0]  ;;  %v626_v32 = vld [vmem:[%s747_s6 + $0x2c] sm:$0xf] }
  0x2a   : > { %385 = vmatpush.bf16.msra.mxu3 %v613_v24  ;;  %v593_v33 = vor.u32 %v628_v31, %v592_v30  ;;  %v594_v34 = vld [vmem:[%s747_s6 + $0x38] sm:$0xf0]  ;;  %v568_v35 = vld [vmem:[%s747_s6] sm:$0xf]  ;;  %v623_v36 = vld [vmem:[%s747_s6 + $0xc] sm:$0xf0] }
  0x2b   : > { %v597_v37 = vor.u32 %v626_v32, %v594_v34  ;;  %v621_v38 = vld [vmem:[%s747_s6 + $0x4] sm:$0xf]  ;;  %v570_v39 = vld [vmem:[%s747_s6 + $0x10] sm:$0xf0]  ;;  %v576_v40 = vld [vmem:[%s747_s6 + $0x8] sm:$0xf]  ;;  %v569_v41 = vor.u32 %v623_v36, %v568_v35 }
  0x2c   : > { %347 = vmatpush.bf16.msra.mxu0 %v585_v28  ;;  %v624_v42 = vld [vmem:[%s747_s6 + $0x14] sm:$0xf0]  ;;  %v622_v43 = vld [vmem:[%s747_s6 + $0xc] sm:$0xf]  ;;  %v578_v44 = vld [vmem:[%s747_s6 + $0x18] sm:$0xf0]  ;;  %v573_v45 = vor.u32 %v621_v38, %v570_v39 }
  0x2d   : > { %360 = vmatpush.bf16.msra.mxu1 %v589_v29  ;;  %373 = vmatpush.bf16.msra.mxu2 %v593_v33  ;;  %v577_v46 = vor.u32 %v624_v42, %v576_v40  ;;  %v581_v47 = vor.u32 %v622_v43, %v578_v44  ;;  %v264_v48 = vld [vmem:[%s808_s0] sm:$0x3]  ;;  %vm337_vm0 = vcmask 392192   ;;  %s817_s9 = smov (!%p250_p8, %s562_s9), 255  ;;  %vm399_vm1 = vcmask 1043456   ;;  %s819_s18 = smov (!%p255_p9, %s724_s18), 63 }
  0x2e   : > { %386 = vmatpush.bf16.msra.mxu3 %v597_v37  ;;  %s563_s10 = sshll.u32 %s817_s9, 2  ;;  %s564_s14 = sshll.u32 %s819_s18, 2  ;;  %vm415_vm2 = vcmask 3072  }
  0x2f   : > { %s253_s13 = scalar_lea.vmem %s810_s2, %s563_s10  ;;  %s258_s20 = scalar_lea.vmem %s811_s3, %s564_s14 }
  0x30   : > { %348 = vmatpush.bf16.msra.mxu0 %v569_v41  ;;  %s262_s24 = scalar_lea.vmem %s812_s4, %s564_s14 }
  0x31   : > { %361 = vmatpush.bf16.msra.mxu1 %v573_v45  ;;  %374 = vmatpush.bf16.msra.mxu2 %v577_v46 }
  0x32   : > { %387 = vmatpush.bf16.msra.mxu3 %v581_v47 }
  0x33   : > { %614 = vmatmul.msk.bf16.vlgmr.msra.gmra.mxu0 %vm337_vm0, %v264_v48 }
  0x34   : > { %615 = vmatmul.msk.bf16.vlgmr.msra.gmra.mxu1 %vm337_vm0, %v264_v48  ;;  %616 = vmatmul.msk.bf16.vlgmr.msra.gmra.mxu2 %vm337_vm0, %v264_v48 }
  0x35   : > { %617 = vmatmul.msk.bf16.vlgmr.msra.gmra.mxu3 %vm337_vm0, %v264_v48 }
  0xb0   : > { %v350_v49 = vpop.f32.mrf.mxu0 }
  0xb1   : > { %v363_v50 = vpop.f32.mrf.mxu1  ;;  %v406_v51 = vsel %vm399_vm1, %v350_v49, 0.0  ;;  %v417_v54 = vmul.f32 %v350_v49, %v350_v49 }
  0xb2   : > { %v397_v52 = vrot.slane %v363_v50, 4  ;;  %v407_v53 = vsel %vm399_vm1, %v363_v50, 0.0  ;;  %v418_v56 = vmul.f32 %v363_v50, %v363_v50 }
  0xb3   : > { %v408_v57 = vadd.f32 %v407_v53, %v406_v51  ;;  %v421_v59 = vsel %vm399_vm1, %v417_v54, 0.0 }
  0xb4   : > { %v400_v55 = vsel %vm399_vm1, %v350_v49, %v397_v52  ;;  %v422_v60 = vsel %vm399_vm1, %v418_v56, 0.0 }
  0xb5   : > { %404 = vst [vmem:[%s253_s13] sm:$0xff] %v400_v55  ;;  %v423_v7 = vadd.f32 %v422_v60, %v421_v59 }
  0xb7   : > { %v376_v58 = vpop.f32.mrf.mxu2 }
  0xb8   : > { %v419_v61 = vmul.f32 %v376_v58, %v376_v58  ;;  %v389_v62 = vpop.f32.mrf.mxu3  ;;  %v352_v63 = vpop.f32.mrf.mxu0  ;;  %v409_v0 = vsel %vm399_vm1, %v376_v58, 0.0 }
  0xb9   : > { %v398_v1 = vrot.slane %v389_v62, 4  ;;  %v365_v2 = vpop.f32.mrf.mxu1  ;;  %v410_v3 = vadd.f32 %v409_v0, %v408_v57  ;;  %v411_v4 = vsel %vm399_vm1, %v389_v62, 0.0  ;;  %v420_v8 = vmul.f32 %v389_v62, %v389_v62 }
  0xba   : > { %v424_v9 = vsel %vm399_vm1, %v419_v61, 0.0 }
  0xbb   : > { %v401_v5 = vsel %vm399_vm1, %v376_v58, %v398_v1  ;;  %v412_v6 = vadd.f32 %v411_v4, %v410_v3  ;;  %v425_v11 = vadd.f32 %v424_v9, %v423_v7  ;;  %v426_v13 = vsel %vm399_vm1, %v420_v8, 0.0 }
  0xbc   : > { %405 = vst [vmem:[%s253_s13 + $0x8] sm:$0xff] %v401_v5 }
  0xbd   : > { %413 = vadd.xlane.f32.xlu0 %v412_v6  ;;  %v427_v14 = vadd.f32 %v426_v13, %v425_v11 }
  0xbf   : > { %v378_v10 = vpop.f32.mrf.mxu2 }
  0xc0   : > { %v391_v12 = vpop.f32.mrf.mxu3 }
  0xc5   : > { %428 = vadd.xlane.f32.xlu0 %v427_v14 }
 0x130   : > { %v414_v15 = vpop.xlane.xlu0 %413 }
 0x131   : > { %416 = vst.msk [vmem:[%s258_s20] sm:$0xf] %vm415_vm2, %v414_v15 }
 0x138   : > { %v429_v16 = vpop.xlane.xlu0 %428 }
 0x139   : > { %430 = vst.msk [vmem:[%s262_s24] sm:$0xf] %vm415_vm2, %v429_v16 }
 0x13a PF: > { %p12_p10 = scmp.ge.s32.totalorder %s727_s19, 66   ;;  %s813_s15 = smov %s677_s16 }
 0x13b   : > { %s814_s16 = smov %s736_s22  ;;  %s815_s17 = smov %s727_s19 }
 0x13c   :  { %14 = sbr.rel (!%p12_p10) target bundleno = 2 (0x2), region = 110 }

// kernel: mul.4
= control target key start
LH: loop header
LB: loop body
LE: loop exit
PB: predicated region body
PF: predicated region fallthrough
CT: control target
= control target key end

     0   :  { %s34_s0 = inlined_call_operand.vmem [shape: f32[4,1], index: 0, kind: input, shape index: {}]   ;;  %s35_s1 = inlined_call_operand.vmem [shape: f32[4,1], index: 1, kind: input, shape index: {}]   ;;  %s36_s2 = inlined_call_operand.vmem [shape: f32[4,1], index: 2, kind: output, shape index: {}]  }
   0x1   :  { %v3_v0 = vld [vmem:[%s34_s0] sm:$0xf] }
   0x2   :  { %v4_v1 = vld [vmem:[%s35_s1] sm:$0xf] }
   0x3   :  { %v7_v2 = vmul.f32 %v4_v1, %v3_v0 }
   0x5   :  { %9 = vst [vmem:[%s36_s2] sm:$0xf] %v7_v2 }

// kernel: conv_bn_lrelu_block.3
= control target key start
LH: loop header
LB: loop body
LE: loop exit
PB: predicated region body
PF: predicated region fallthrough
CT: control target
= control target key end

     0   :  { %s316_s12 = smov 0   ;;  %s339_s0 = inlined_call_operand.vmem [shape: f32[4,1], index: 0, kind: input, shape index: {}]   ;;  %s340_s1 = inlined_call_operand.vmem [shape: f32[4,1], index: 1, kind: input, shape index: {}]   ;;  %s341_s2 = inlined_call_operand.vmem [shape: f32[4,32768], index: 2, kind: input, shape index: {}]   ;;  %s342_s3 = inlined_call_operand.vmem [shape: f32[4,32768], index: 3, kind: output, shape index: {}]  }
   0x1 LB: > { %s264_s13 = sadd.s32 4294967295, %s292_s12   ;;  %p268_p0 = scmp.ge.s32.totalorder %s292_s12, 1  ;;  %s292_s12 = sphi %s316_s12, %s13_s12  }
   0x2   : > { %p138_p1 = scmp.lt.s32.totalorder %s292_s12, 65 }
   0x4   : > { %p139_p2 = pnand %p268_p0, %p138_p1 }
   0x5   : > { %s269_s18 = sshll.u32 (!%p139_p2), %s264_s13, 2 }
   0x6   : > { %142 = sbr.rel (%p139_p2) target bundleno = 145 (0x91), region = 32  ;;  %p163_p3 = scmp.lt.s32.totalorder (!%p139_p2), %s269_s18, 255 }
   0xb   : > { %v176_v0 = vld [vmem:[%s339_s0] sm:$0xf]  ;;  %v294_v1 = vmov 0   ;;  %s344_s18 = smov (!%p163_p3, %s269_s18), 255  ;;  %v295_v3 = vmov 839922192  }
   0xc   : > { %285 = vset.pattern.permute.xlu0 %v294_v1  ;;  %v188_v2 = vld [vmem:[%s340_s1] sm:$0xf]  ;;  %v182_v4 = vunpack.c.l.s4 %v295_v3  ;;  %s270_s19 = sshll.u32 %s344_s18, 2 }
   0xd   : > { %179 = vperm.xlu0 %285, %v176_v0   ;;  %s166_s22 = scalar_lea.vmem %s341_s2, %s270_s19  ;;  %s172_s25 = scalar_lea.vmem %s342_s3, %s270_s19 }
   0xe   : > { %v183_v6 = vunpack.c.0.s8 %v182_v4  ;;  %v174_v8 = vld [vmem:[%s166_s22] sm:$0xff]  ;;  %v175_v9 = vld [vmem:[%s166_s22 + $0x8] sm:$0xff] }
  0x15   : > { %191 = vperm.xlu0 %285, %v188_v2  }
  0x7f   : > { %v180_v5 = vpop.permute.xlu0 %179 }
  0x80   : > { %v184_v7 = vperm.slane %v180_v5, %v183_v6 }
  0x82   : > { %v186_v11 = vmul.f32 %v184_v7, %v174_v8  ;;  %v187_v12 = vmul.f32 %v184_v7, %v175_v9 }
  0x87   : > { %v192_v10 = vpop.permute.xlu0 %191 }
  0x88   : > { %v196_v13 = vperm.slane %v192_v10, %v183_v6 }
  0x8a   : > { %v198_v14 = vadd.f32 %v196_v13, %v186_v11  ;;  %v199_v15 = vadd.f32 %v196_v13, %v187_v12 }
  0x8c   : > { %vm200_vm0 = vcmp.ge.f32.partialorder %v198_v14, 0.0  ;;  %vm201_vm1 = vcmp.ge.f32.partialorder %v199_v15, 0.0  ;;  %v202_v16 = vmul.f32 0.2, %v198_v14  ;;  %v203_v17 = vmul.f32 0.2, %v199_v15 }
  0x8e   : > { %v204_v18 = vsel %vm200_vm0, %v198_v14, %v202_v16  ;;  %v205_v19 = vsel %vm201_vm1, %v199_v15, %v203_v17 }
  0x8f   : > { %206 = vst [vmem:[%s172_s25] sm:$0xff] %v204_v18 }
  0x90   : > { %207 = vst [vmem:[%s172_s25 + $0x8] sm:$0xff] %v205_v19 }
  0x91 PF: > { %s13_s12 = sadd.s32 1, %s292_s12  }
  0x92   : > { %p10_p4 = scmp.ge.s32.totalorder %s13_s12, 66  }
  0x94   :  { %12 = sbr.rel (!%p10_p4) target bundleno = 1 (0x1), region = 62 }

</bundles_post_ra>
